<compile_context>
chip_gen: v5e
topology: v5e:2x2
jax: 0.10.0
libtpu: 0.0.40
codegen_flags: <defaults>
</compile_context>

<pallas_src>
import functools

import jax
import jax.numpy as jnp
from jax.experimental import pallas as pl
from jax.experimental.pallas import tpu as pltpu


# --------------------------------------------------------------------------- #
# Prologue kernel: adaptive adjacency, computed once per forward call.
# --------------------------------------------------------------------------- #
def _adjacency_kernel(e_ref, a_ref):
    """A = softmax(relu(E @ E^T), axis=1), kept in f32."""
    E = e_ref[...]
    logits = jnp.maximum(
        jnp.dot(E, E.T, preferred_element_type=jnp.float32), 0.0)
    m = jnp.max(logits, axis=1, keepdims=True)
    p = jnp.exp(logits - m)
    a_ref[...] = p / jnp.sum(p, axis=1, keepdims=True)


# --------------------------------------------------------------------------- #
# Main kernel: one batch tile per grid step ("parallel" axis).
# --------------------------------------------------------------------------- #
def _agcrn_step_kernel(a_ref, e_ref, xt_ref, ht_ref, wr_ref, wu_ref, bias_ref,
                       o_ref, *, K, D, Din, Dout, Bt, mxu_dtype):
    """Per-tile AGCRN GRU step.

    a_ref   : (N, N)              adaptive adjacency (resident, f32)
    e_ref   : (N, D)              node embeddings    (resident, f32)
    xt_ref  : (N, Bt*Din)         node-major inputs,  [n, b*Din + i] = x[b, n, i]
    ht_ref  : (N, Bt*Dout)        node-major state,   [n, b*Dout + j]
    wr_ref  : (K*C, D*2*Dout)     fused reset weights, rows (k, feat), cols d-major
    wu_ref  : (K*C, D*Dout)       fused update weights
    bias_ref: (D, 3*Dout)         [b_reset | b_update]
    o_ref   : (N, Bt*Dout)        new hidden state, node-major
    """
    N = a_ref.shape[0]
    NBt = N * Bt
    O2 = 2 * Dout
    f32 = jnp.float32

    A = a_ref[...].astype(mxu_dtype)          # MXU operand (softmax done in f32)
    E = e_ref[...]                            # (N, D) f32
    Xt = xt_ref[...].astype(f32)              # (N, Bt*Din)
    Ht = ht_ref[...].astype(f32)              # (N, Bt*Dout)

    def cheb_rows(F, w):
        # Chebyshev propagation applied directly to features (identity support
        # elided), each support reshaped to (node, batch)-rows of width w.
        pieces = [F.reshape(NBt, w)]
        p1 = jnp.dot(A, F.astype(mxu_dtype), preferred_element_type=f32)
        pieces.append(p1.reshape(NBt, w))
        pm2, pm1 = F, p1
        for _ in range(K - 2):
            pj = 2.0 * jnp.dot(A, pm1.astype(mxu_dtype),
                               preferred_element_type=f32) - pm2
            pieces.append(pj.reshape(NBt, w))
            pm2, pm1 = pm1, pj
        return pieces                          # K x (NBt, w), f32

    GX = cheb_rows(Xt, Din)                    # reused by both gates
    GH = cheb_rows(Ht, Dout)

    # Per-(node, batch) embedding rows (tiny; replaces the old giant ET slab).
    Erep = jnp.broadcast_to(E[:, None, :], (N, Bt, D)).reshape(NBt, D)
    Ball = jnp.dot(Erep, bias_ref[...], preferred_element_type=f32)  # (NBt, 3*Dout)
    Br = Ball[:, :O2]
    Bu = Ball[:, O2:]

    def efold(T, width):
        # T[:, d*width + o]  ->  out[:, o] = sum_d E[n, d] * T[:, d*width + o]
        # D unrolled VPU scale-and-accumulate steps (no dense fold matmul).
        acc = Erep[:, 0:1] * T[:, 0:width]
        for d in range(1, D):
            acc = acc + Erep[:, d:d + 1] * T[:, d * width:(d + 1) * width]
        return acc

    # ---- reset / update gates: single fused deep-contraction dot ------------
    G_r = jnp.concatenate(GX + GH, axis=1).astype(mxu_dtype)        # (NBt, K*C)
    Tr = jnp.dot(G_r, wr_ref[...], preferred_element_type=f32)      # (NBt, D*O2)
    zr = jax.nn.sigmoid(efold(Tr, O2) + Br)
    z = zr[:, :Dout]
    r = zr[:, Dout:]

    # ---- candidate state: only r*state is re-propagated ----------------------
    H_nb = Ht.reshape(NBt, Dout)
    rH_node = (r * H_nb).reshape(N, Bt * Dout)
    GRH = cheb_rows(rH_node, Dout)
    G_u = jnp.concatenate(GX + GRH, axis=1).astype(mxu_dtype)       # (NBt, K*C)
    Tu = jnp.dot(G_u, wu_ref[...], preferred_element_type=f32)      # (NBt, D*Dout)
    hc = jnp.tanh(efold(Tu, Dout) + Bu)

    out_nb = z * H_nb + (1.0 - z) * hc                               # f32 blend
    o_ref[...] = out_nb.reshape(N, Bt * Dout).astype(o_ref.dtype)


# --------------------------------------------------------------------------- #
# Wrapper
# --------------------------------------------------------------------------- #
def _prepare_agcrn_weights(W_reset, W_update, b_reset, b_update, Din, mxu_dtype):
    """Weight re-layout, hoistable outside a recurrent scan (done once)."""
    D, K, C, O2 = W_reset.shape
    Dout = O2 // 2
    # d-major output layout: rows (k, feat), cols (d, o)  ->  VPU E-fold.
    Wxr = jnp.transpose(W_reset[:, :, :Din, :], (1, 2, 0, 3)).reshape(K * Din, D * O2)
    Wsr = jnp.transpose(W_reset[:, :, Din:, :], (1, 2, 0, 3)).reshape(K * Dout, D * O2)
    Wxu = jnp.transpose(W_update[:, :, :Din, :], (1, 2, 0, 3)).reshape(K * Din, D * Dout)
    Wsu = jnp.transpose(W_update[:, :, Din:, :], (1, 2, 0, 3)).reshape(K * Dout, D * Dout)
    Wr_all = jnp.concatenate([Wxr, Wsr], axis=0).astype(mxu_dtype)   # (K*C, D*2*Dout)
    Wu_all = jnp.concatenate([Wxu, Wsu], axis=0).astype(mxu_dtype)   # (K*C, D*Dout)
    bcat = jnp.concatenate([b_reset, b_update], axis=1).astype(jnp.float32)
    return Wr_all, Wu_all, bcat


def _choose_batch_tile(B, N, Din, Dout, D, K, vmem_budget_bytes=40 * 1024 * 1024):
    """Largest divisor of B whose per-tile working set fits the VMEM budget,
    preferring lane-dense tiles (Bt*Dout a multiple of 128)."""
    C = Din + Dout

    def tile_bytes(bt):
        nbt = N * bt
        act_io = 2 * N * bt * (Din + 2 * Dout) * 4        # double-buffered tiles
        rows = nbt * (2 * K * C) * 4                      # G_r / G_u row slabs
        t_slab = nbt * D * 3 * Dout * 4                   # Tr + Tu
        misc = nbt * (D + 4 * Dout) * 4                   # Erep, biases, gates
        return act_io + rows + t_slab + misc

    divisors = [bt for bt in range(B, 0, -1) if B % bt == 0]
    for bt in divisors:
        if (bt * Dout) % 128 == 0 and tile_bytes(bt) <= vmem_budget_bytes:
            return bt
    for bt in divisors:
        if tile_bytes(bt) <= vmem_budget_bytes:
            return bt
    return 1


def agcrn_layer(x, state, node_embeddings, W_reset, W_update, b_reset, b_update,
                *, batch_tile=None, mxu_dtype=jnp.bfloat16):
    """AGCRN GRU cell forward.  x: (B, N, Din), state: (B, N, Dout)."""
    B, N, Din = x.shape
    Dout = state.shape[-1]
    D, K, C, O2 = W_reset.shape                   # C = Din + Dout, O2 = 2*Dout
    assert C == Din + Dout and O2 == 2 * Dout
    assert node_embeddings.shape == (N, D)
    assert K >= 2, "AGCRN Chebyshev order K must be >= 2 (matches the module)."

    f32 = jnp.float32
    if batch_tile is None:
        batch_tile = _choose_batch_tile(B, N, Din, Dout, D, K)
    Bt = batch_tile
    assert B % Bt == 0, "batch_tile must divide the batch size"
    nt = B // Bt

    E = node_embeddings.astype(f32)

    # Adaptive adjacency: batch-invariant, computed exactly once.
    A = pl.pallas_call(
        _adjacency_kernel,
        out_shape=jax.ShapeDtypeStruct((N, N), f32),
    )(E)

    # Weight re-layout (hoist this call outside lax.scan for recurrent use).
    Wr_all, Wu_all, bcat = _prepare_agcrn_weights(
        W_reset, W_update, b_reset, b_update, Din, mxu_dtype)

    # Layout plumbing: node-major, batch-tiled activation slabs.
    #   xt[t, n, b*Din + i] = x[t*Bt + b, n, i]
    xt = jnp.transpose(x.astype(f32).reshape(nt, Bt, N, Din),
                       (0, 2, 1, 3)).reshape(nt, N, Bt * Din)
    ht = jnp.transpose(state.astype(f32).reshape(nt, Bt, N, Dout),
                       (0, 2, 1, 3)).reshape(nt, N, Bt * Dout)

    kernel = functools.partial(_agcrn_step_kernel, K=K, D=D, Din=Din,
                               Dout=Dout, Bt=Bt, mxu_dtype=mxu_dtype)

    out_tiles = pl.pallas_call(
        kernel,
        out_shape=jax.ShapeDtypeStruct((nt, N, Bt * Dout), f32),
        grid=(nt,),
        in_specs=[
            pl.BlockSpec((N, N), lambda i: (0, 0)),                 # A (resident)
            pl.BlockSpec((N, D), lambda i: (0, 0)),                 # E (resident)
            pl.BlockSpec((None, N, Bt * Din), lambda i: (i, 0, 0)),   # x tile
            pl.BlockSpec((None, N, Bt * Dout), lambda i: (i, 0, 0)),  # h tile
            pl.BlockSpec((K * C, D * O2), lambda i: (0, 0)),        # W_reset (resident)
            pl.BlockSpec((K * C, D * Dout), lambda i: (0, 0)),      # W_update (resident)
            pl.BlockSpec((D, 3 * Dout), lambda i: (0, 0)),          # biases (resident)
        ],
        out_specs=pl.BlockSpec((None, N, Bt * Dout), lambda i: (i, 0, 0)),
        compiler_params=pltpu.CompilerParams(
            dimension_semantics=("parallel",),        # megacore over batch tiles
            vmem_limit_bytes=48 * 1024 * 1024),
    )(A, E, xt, ht, Wr_all, Wu_all, bcat)

    # Back to the module's (B, N, Dout) convention.  A recurrent caller should
    # keep the node-major tiled layout across timesteps instead of paying this.
    out = jnp.transpose(out_tiles.reshape(nt, N, Bt, Dout),
                        (0, 2, 1, 3)).reshape(B, N, Dout)
    return out


# --------------------------------------------------------------------------- #
# Pure-JAX reference (restates the PyTorch forward) for verification.
# --------------------------------------------------------------------------- #
def agcrn_reference(x, state, E, W_r, W_u, b_r, b_u):
    N, _ = E.shape
    K = W_r.shape[1]
    Dout = W_u.shape[-1]
    A = jax.nn.softmax(jax.nn.relu(E @ E.T), axis=1)
    S = [jnp.eye(N, dtype=jnp.float32), A]
    for _ in range(K - 2):
        S.append(2.0 * A @ S[-1] - S[-2])
    S = jnp.stack(S)                                          # (K, N, N)

    feat = jnp.concatenate([x, state], axis=2)                # (B, N, C)
    xg = jnp.einsum('knm,bmc->bnkc', S, feat)
    Wn = jnp.einsum('nd,dkio->nkio', E, W_r)
    zr = jax.nn.sigmoid(jnp.einsum('bnki,nkio->bno', xg, Wn) + E @ b_r)
    z, r = zr[..., :Dout], zr[..., Dout:]

    cand = jnp.concatenate([x, r * state], axis=-1)
    xgu = jnp.einsum('knm,bmc->bnkc', S, cand)
    Wnu = jnp.einsum('nd,dkio->nkio', E, W_u)
    hc = jnp.tanh(jnp.einsum('bnki,nkio->bno', xgu, Wnu) + E @ b_u)
    return z * state + (1.0 - z) * hc


if __name__ == "__main__":
    # Small, module-consistent shapes.
    B, N, Din, Dout, D, K = 8, 16, 4, 8, 8, 3
    C = Din + Dout

    key = jax.random.PRNGKey(0)
    ks = jax.random.split(key, 7)
    x = jax.random.normal(ks[0], (B, N, Din), jnp.float32)
    state = jax.random.normal(ks[1], (B, N, Dout), jnp.float32)
    node_emb = jax.random.normal(ks[2], (N, D), jnp.float32)
    W_reset = 0.1 * jax.random.normal(ks[3], (D, K, C, 2 * Dout), jnp.float32)
    W_update = 0.1 * jax.random.normal(ks[4], (D, K, C, Dout), jnp.float32)
    b_reset = 0.1 * jax.random.normal(ks[5], (D, 2 * Dout), jnp.float32)
    b_update = 0.1 * jax.random.normal(ks[6], (D, Dout), jnp.float32)

    ref = jax.block_until_ready(
        agcrn_reference(x, state, node_emb, W_reset, W_update, b_reset, b_update))

    # 1) exact-precision path (f32 MXU feeds), explicit 2-tile batch grid.
    out_f32 = jax.block_until_ready(
        agcrn_layer(x, state, node_emb, W_reset, W_update, b_reset, b_update,
                    batch_tile=4, mxu_dtype=jnp.float32))
    assert out_f32.shape == (B, N, Dout)
    err32 = float(jnp.max(jnp.abs(out_f32 - ref)))
    assert jnp.allclose(out_f32, ref, rtol=1e-3, atol=1e-3), (
        "f32 path mismatch vs. reference: max abs err = %g" % err32)

    # 2) performance path: bf16 MXU feeds + auto batch tile selection.
    out_bf16 = jax.block_until_ready(
        agcrn_layer(x, state, node_emb, W_reset, W_update, b_reset, b_update))
    assert out_bf16.shape == (B, N, Dout)
    err16 = float(jnp.max(jnp.abs(out_bf16 - ref)))
    assert jnp.allclose(out_bf16, ref, rtol=5e-2, atol=5e-2), (
        "bf16 path mismatch vs. reference: max abs err = %g" % err16)

    print("KERNEL_OK")
</pallas_src>

<mosaic_0001>
module attributes {stable_mosaic.version = 11 : i64} {
  func.func @_adjacency_kernel(%arg0: memref<16x8xf32, #tpu.memory_space<vmem>>, %arg1: memref<16x16xf32, #tpu.memory_space<vmem>>) attributes {dimension_semantics = [], scalar_prefetch = 0 : i64, scratch_operands = 0 : i64, tpu.core_type = #tpu.core_type<tc>} {
    %c0 = arith.constant 0 : index
    %c0_0 = arith.constant 0 : index
    %0 = vector.load %arg0[%c0, %c0_0] : memref<16x8xf32, #tpu.memory_space<vmem>>, vector<16x8xf32>
    %1 = tpu.transpose %0, [1, 0] : vector<16x8xf32> -> vector<8x16xf32>
    %cst = arith.constant dense<0.000000e+00> : vector<16x16xf32>
    %2 = tpu.matmul %0, %1, %cst {dimension_numbers = #tpu.dot_dimension_numbers<[1], [0], [0], [1], [0, 0, 1, 1], [], []>} : vector<16x8xf32>, vector<8x16xf32>, vector<16x16xf32> -> vector<16x16xf32>
    %cst_1 = arith.constant 0.000000e+00 : f32
    %3 = vector.broadcast %cst_1 : f32 to vector<16x16xf32>
    %4 = arith.maximumf %2, %3 : vector<16x16xf32>
    %cst_2 = arith.constant dense<0xFF800000> : vector<16xf32>
    %5 = vector.multi_reduction <maximumf>, %4, %cst_2 [1] : vector<16x16xf32> to vector<16xf32>
    %6 = vector.shape_cast %5 : vector<16xf32> to vector<16x1xf32>
    %7 = vector.broadcast %6 : vector<16x1xf32> to vector<16x16xf32>
    %8 = arith.subf %4, %7 : vector<16x16xf32>
    %9 = math.exp %8 : vector<16x16xf32>
    %cst_3 = arith.constant dense<0.000000e+00> : vector<16xf32>
    %10 = vector.multi_reduction <add>, %9, %cst_3 [1] : vector<16x16xf32> to vector<16xf32>
    %11 = vector.shape_cast %10 : vector<16xf32> to vector<16x1xf32>
    %12 = vector.broadcast %11 : vector<16x1xf32> to vector<16x16xf32>
    %13 = arith.divf %9, %12 : vector<16x16xf32>
    %c0_4 = arith.constant 0 : index
    %c0_5 = arith.constant 0 : index
    %14 = vector.load %arg1[%c0_4, %c0_5] : memref<16x16xf32, #tpu.memory_space<vmem>>, vector<16x16xf32>
    tpu.vector_store %arg1[%c0_4, %c0_5], %13 {strides = array<i32>} : memref<16x16xf32, #tpu.memory_space<vmem>>, vector<16x16xf32>,
    return
  }
}

</mosaic_0001>

<bundles_post_ra>
// kernel: tpu_custom_call.1
= control target key start
LH: loop header
LB: loop body
LE: loop exit
PB: predicated region body
PF: predicated region fallthrough
CT: control target
= control target key end

     0   :  { %vm11_vm0 = vcmask 64512   ;;  %s183_s0 = inlined_call_operand.vmem [shape: f32[16,8], index: 0, kind: input, shape index: {}]   ;;  %s184_s1 = inlined_call_operand.hbm [shape: f32[16,16], index: 1, kind: output, shape index: {}]  }
   0x1   :  { %v10_v0 = vld [vmem:[%s183_s0 + $0x8] sm:$0xff] }
   0x2   :  { %6 = vsyncpa [#allocation3], 0  ;;  %112 = vmatpush.xpose.msk.msra.mxu0 %vm11_vm0, %v10_v0  ;;  %116 = vmatpush.xpose.msk.msra.mxu1 %vm11_vm0, %v10_v0  ;;  %v9_v1 = vld [vmem:[%s183_s0] sm:$0xff]  ;;  %vm43_vm1 = vcmask 130048   ;;  %s155_s0 = smov [#allocation2]   ;;  %s100_s13 = sshll.u32 %s184_s1, 4  ;;  %s101_s13 = int_to_ptr.hbm [resolvable:$true] %s100_s13 }
   0x3   :  { %s98_s10 = sshll.u32 %s155_s0, 4  ;;  %s156_s14 = smov 128   ;;  %s99_s10 = int_to_ptr.vmem [resolvable:$true] %s98_s10 }
   0x4   :  { %s157_s15 = smov 8  }
   0x6   :  { %113 = vmatpush.xpose.msk.msra.mxu0 %vm11_vm0, %v9_v1  ;;  %117 = vmatpush.xpose.msk.msra.mxu1 %vm11_vm0, %v9_v1 }
   0x9   :  { %114 = vmatmul.msk.f32.vlgmr.msra.gmra.mxu0 %vm11_vm0, %v9_v1  ;;  %115 = vmatmul.msk.f32.vlgmr.msra.gmra.mxu1 %vm11_vm0, %v10_v0 }
  0x86   :  { %v35_v2 = vpop.f32.mrf.mxu0  ;;  %v38_v4 = vpop.f32.mrf.mxu1 }
  0x87   :  { %v41_v3 = vmax.f32 %v35_v2, 0.0  ;;  %v42_v6 = vmax.f32 %v38_v4, 0.0 }
  0x89   :  { %v44_v5 = vsel %vm43_vm1, %v41_v3, -inf  ;;  %v47_v7 = vsel %vm43_vm1, %v42_v6, -inf }
  0x8a   :  { %45 = vmax.xlane.f32.xlu0 %v44_v5 }
  0x92   :  { %48 = vmax.xlane.f32.xlu0 %v47_v7 }
  0xfd   :  { %v46_v8 = vpop.xlane.xlu0 %45 }
  0xfe   :  { %v50_v9 = vsub.f32 %v41_v3, %v46_v8 }
 0x100   :  { %v52_v10 = vmul.f32 1.442695, %v50_v9 }
 0x102   :  { %121 = vpow2.f32 %v52_v10 }
 0x105   :  { %v49_v11 = vpop.xlane.xlu0 %48 }
 0x106   :  { %v51_v12 = vsub.f32 %v42_v6, %v49_v11 }
 0x108   :  { %v122_v13 = vpop.eup %121  ;;  %v54_v14 = vmul.f32 1.442695, %v51_v12 }
 0x109   :  { %v56_v15 = vsel %vm43_vm1, %v122_v13, 0.0 }
 0x10a   :  { %123 = vpow2.f32 %v54_v14  ;;  %57 = vadd.xlane.f32.xlu1 %v56_v15 }
 0x110   :  { %v124_v16 = vpop.eup %123 }
 0x111   :  { %v59_v17 = vsel %vm43_vm1, %v124_v16, 0.0 }
 0x112   :  { %60 = vadd.xlane.f32.xlu1 %v59_v17 }
 0x17d   :  { %v58_v18 = vpop.xlane.xlu1 %57 }
 0x17e   :  { %125 = vrcp.f32 %v58_v18  ;;  %v73_v23 = vand.u32 2147483648, %v58_v18  ;;  %v71_v25 = vand.u32 2147483647, %v58_v18  ;;  %vm67_vm3 = vweird.f32 %v58_v18 }
 0x180   :  { %v74_v28 = vor.u32 1.1754944e-38, %v73_v23  ;;  %vm72_vm5 = vcmp.eq.f32.partialorder %v71_v25, 8.507059e+37 }
 0x184   :  { %v126_v19 = vpop.eup %125 }
 0x185   :  { %v63_v20 = vmul.f32 %v126_v19, %v58_v18  ;;  %v61_v21 = vpop.xlane.xlu1 %60  ;;  %vm68_vm2 = vweird.f32 %v126_v19 }
 0x186   :  { %127 = vrcp.f32 %v61_v21  ;;  %vm69_vm4 = vmor %vm67_vm3, %vm68_vm2  ;;  %v88_v34 = vand.u32 2147483648, %v61_v21  ;;  %v86_v36 = vand.u32 2147483647, %v61_v21  ;;  %vm82_vm7 = vweird.f32 %v61_v21 }
 0x187   :  { %v64_v22 = vsub.f32 1.0, %v63_v20 }
 0x188   :  { %v89_v38 = vor.u32 1.1754944e-38, %v88_v34  ;;  %vm87_vm9 = vcmp.eq.f32.partialorder %v86_v36, 8.507059e+37 }
 0x189   :  { %v65_v24 = vmul.f32 %v126_v19, %v64_v22 }
 0x18b   :  { %v66_v26 = vadd.f32 %v126_v19, %v65_v24 }
 0x18c   :  { %v128_v27 = vpop.eup %127 }
 0x18d   :  { %v70_v29 = vsel %vm69_vm4, %v126_v19, %v66_v26  ;;  %v78_v30 = vmul.f32 %v128_v27, %v61_v21  ;;  %vm83_vm6 = vweird.f32 %v128_v27 }
 0x18e   :  { %v75_v31 = vsel %vm72_vm5, %v74_v28, %v70_v29  ;;  %vm84_vm8 = vmor %vm82_vm7, %vm83_vm6 }
 0x18f   :  { %v76_v32 = vmul.f32 %v122_v13, %v75_v31  ;;  %v79_v33 = vsub.f32 1.0, %v78_v30 }
 0x191   :  { %92 = vst.msk [vmem:[#allocation2] sm:$0xff] %vm43_vm1, %v76_v32  ;;  %v80_v35 = vmul.f32 %v128_v27, %v79_v33 }
 0x193   :  { %v81_v37 = vadd.f32 %v128_v27, %v80_v35 }
 0x195   :  { %v85_v39 = vsel %vm84_vm8, %v128_v27, %v81_v37 }
 0x196   :  { %v90_v40 = vsel %vm87_vm9, %v89_v38, %v85_v39 }
 0x197   :  { %v91_v41 = vmul.f32 %v124_v16, %v90_v40 }
 0x199   :  { %93 = vst.msk [vmem:[#allocation2 + $0x8] sm:$0xff] %vm43_vm1, %v91_v41 }
 0x19a   :  { %106 = dma.vmem_to_hbm [thread:$0]  %s99_s10, 256, %s101_s13, [#allocation3], %s156_s14, %s156_s14, %s157_s15  }
 0x19b   :  { %153 = dma.done.wait [#allocation3], 256  }
 0x19c   :  { %154 = vsyncadd [#allocation3], 4294967040 }
 0x19d   :  { %111 = vsyncpa [#allocation3], 1 }

</bundles_post_ra>
